<compile_context>
chip_gen: v6e
topology: v6e:2x2x1
jax: 0.10.0
libtpu: 0.0.40
codegen_flags: <defaults>
</compile_context>

<pallas_src>
import functools

import jax
import jax.numpy as jnp
from jax import lax
from jax.experimental import pallas as pl
from jax.experimental.pallas import tpu as pltpu


def _round_up(a: int, b: int) -> int:
    return (a + b - 1) // b * b


def _vmem_footprint(tile: int, n_in: int, y_rows: int, out_bytes: int,
                    cdt_bytes: int) -> int:
    """Rough double-buffered VMEM footprint (bytes) of one pipeline stage."""
    lane = lambda n: _round_up(max(n, 1), 128)
    sub = lambda n: _round_up(max(n, 1), 8)
    x_blk = sub(tile) * lane(n_in) * cdt_bytes
    y_blk = sub(y_rows) * lane(n_in) * cdt_bytes
    w_blk = sub(n_in) * lane(n_in + 1) * cdt_bytes
    wb_blk = sub(1) * lane(n_in + 1) * cdt_bytes
    o_blk = sub(tile) * lane(tile) * out_bytes
    scratch = sub(tile) * lane(n_in) * cdt_bytes + sub(tile) * lane(1) * 4
    return 2 * (x_blk + y_blk + w_blk + wb_blk + o_blk) + scratch


def _biaffine_kernel(x_ref, y_ref, w_ref, wb_ref, o_ref, xw_ref, col_ref, *,
                     n_in, tile_k, inv_scale, y_resident):
    # x_ref : (1, TQ, n_in)          y_ref : (1, Sp, n_in) or (1, TK, n_in)
    # w_ref : (1, n_in, n_in+1)      wb_ref: (1, 1, n_in+1)
    # o_ref : (1, 1, TQ, TK)
    # xw_ref: (TQ, n_in) scratch     col_ref: (TQ, 1) f32 scratch
    k = pl.program_id(3)

    @pl.when(k == 0)
    def _():
        # One MXU dot yields both the x@Wm intermediate AND the bias_y column
        # term (the extra output column) -> no per-tile VPU mul + XLU reduce.
        r = jnp.dot(x_ref[0], w_ref[0], preferred_element_type=jnp.float32)
        r = r + wb_ref[0]                                   # [1, n_in+1] bcast
        if inv_scale != 1.0:        # static; fully elided when scale == 0
            r = r * inv_scale
        xw_ref[...] = r[:, :n_in].astype(xw_ref.dtype)
        col_ref[...] = r[:, n_in:]

    if y_resident:
        start = pl.multiple_of(k * tile_k, tile_k)
        y_t = y_ref[0, pl.ds(start, tile_k), :]             # [TK, n_in]
    else:
        y_t = y_ref[0]                                      # [TK, n_in]

    # s = xw @ y^T, transpose-free (contract the feature dims directly).
    s = lax.dot_general(xw_ref[...], y_t, (((1,), (1,)), ((), ())),
                        preferred_element_type=jnp.float32)
    s = s + col_ref[...]
    o_ref[0, 0] = s.astype(o_ref.dtype)


def biaffine_forward(x, y, weight, *, n_in, scale=0, bias_x=True, bias_y=True,
                     compute_dtype=jnp.bfloat16, out_dtype=None,
                     max_tile=512, vmem_budget=12 * 1024 * 1024):
    """x, y: [B, S, n_in]; weight: [n_out, n_in + bias_x, n_in + bias_y]."""
    B, S, _ = x.shape
    n_out = weight.shape[0]
    out_dtype = x.dtype if out_dtype is None else out_dtype
    out_bytes = jnp.dtype(out_dtype).itemsize
    cdt_bytes = jnp.dtype(compute_dtype).itemsize

    # ---- Weight decomposition (wrapper-side, weight is tiny) ---------------
    w_main = weight[:, :n_in, :n_in]
    w_by_col = (weight[:, :n_in, n_in:n_in + 1] if bias_y
                else jnp.zeros((n_out, n_in, 1), weight.dtype))
    w_bx_row = (weight[:, n_in:n_in + 1, :n_in] if bias_x
                else jnp.zeros((n_out, 1, n_in), weight.dtype))
    w_c = (weight[:, n_in:n_in + 1, n_in:n_in + 1] if (bias_x and bias_y)
           else jnp.zeros((n_out, 1, 1), weight.dtype))
    w_big = jnp.concatenate([w_main, w_by_col], axis=2).astype(compute_dtype)
    b_big = jnp.concatenate([w_bx_row, w_c], axis=2).astype(compute_dtype)

    x_c = x.astype(compute_dtype)
    y_c = y.astype(compute_dtype)

    # ---- Tile selection ----------------------------------------------------
    if S <= 128:
        # Small-S path: tile == S -> no padded output rows/cols, exact stores.
        tile = S
    else:
        cands = sorted({t for t in (512, 384, 256, 128)
                        if t <= max(max_tile, 128)},
                       key=lambda t: (_round_up(S, t), -t))
        if B * n_out < 2:
            # v7x: keep >= 2 parallel grid units so both TensorCores work.
            multi = [t for t in cands if pl.cdiv(S, t) >= 2]
            if multi:
                cands = multi
        tile = next((t for t in cands
                     if _vmem_footprint(t, n_in, t, out_bytes,
                                        cdt_bytes) <= vmem_budget), 128)
    n_tiles = pl.cdiv(S, tile)

    # ---- Resident-y decision (cuts y HBM traffic by n_out * n_tiles) -------
    sp_y = n_tiles * tile
    y_resident = _vmem_footprint(tile, n_in, sp_y, out_bytes,
                                 cdt_bytes) <= vmem_budget
    if y_resident:
        if sp_y != S:
            # Only y is padded (cheap); x / output stay ragged and Pallas
            # clips the edge blocks.
            y_c = jnp.pad(y_c, ((0, 0), (0, sp_y - S), (0, 0)))
        y_spec = pl.BlockSpec((1, sp_y, n_in), lambda b, o, q, k: (b, 0, 0))
    else:
        y_spec = pl.BlockSpec((1, tile, n_in), lambda b, o, q, k: (b, k, 0))

    inv_scale = float(1.0 / (n_in ** scale))
    kernel = functools.partial(_biaffine_kernel, n_in=n_in, tile_k=tile,
                               inv_scale=inv_scale, y_resident=y_resident)

    out = pl.pallas_call(
        kernel,
        out_shape=jax.ShapeDtypeStruct((B, n_out, S, S), out_dtype),
        grid_spec=pltpu.PrefetchScalarGridSpec(
            num_scalar_prefetch=0,
            grid=(B, n_out, n_tiles, n_tiles),
            in_specs=[
                pl.BlockSpec((1, tile, n_in),
                             lambda b, o, q, k: (b, q, 0)),                   # x
                y_spec,                                                        # y
                pl.BlockSpec((1, n_in, n_in + 1),
                             lambda b, o, q, k: (o, 0, 0)),                   # W_big
                pl.BlockSpec((1, 1, n_in + 1),
                             lambda b, o, q, k: (o, 0, 0)),                   # b_big
            ],
            out_specs=pl.BlockSpec((1, 1, tile, tile),
                                   lambda b, o, q, k: (b, o, q, k)),
            scratch_shapes=[
                pltpu.VMEM((tile, n_in), compute_dtype),   # x @ W (per q-tile)
                pltpu.VMEM((tile, 1), jnp.float32),        # bias_y column term
            ],
        ),
        compiler_params=pltpu.CompilerParams(
            # k must stay "arbitrary": the xw/col scratch is (re)derived at
            # k == 0 of every (b, o, q) and reused across that k run.
            dimension_semantics=("parallel", "parallel", "parallel",
                                 "arbitrary"),
        ),
    )(x_c, y_c, w_big, b_big)

    if n_out == 1:
        out = jnp.squeeze(out, axis=1)   # matches s.squeeze(1) in the module
    return out


def _reference(x, y, weight, *, n_in, scale, bias_x, bias_y):
    # f32 math on bf16-rounded operands (the same quantization the kernel uses).
    f32 = jnp.float32
    xr = x.astype(jnp.bfloat16).astype(f32)
    yr = y.astype(jnp.bfloat16).astype(f32)
    wr = weight.astype(jnp.bfloat16).astype(f32)
    if bias_x:
        xr = jnp.concatenate([xr, jnp.ones_like(xr[..., :1])], -1)
    if bias_y:
        yr = jnp.concatenate([yr, jnp.ones_like(yr[..., :1])], -1)
    s = jnp.einsum("bxi,oij,byj->boxy", xr, wr, yr,
                   precision=lax.Precision.HIGHEST) / (n_in ** scale)
    if weight.shape[0] == 1:
        s = jnp.squeeze(s, axis=1)
    return s


if __name__ == "__main__":
    kx, ky, kw, k2x, k2y, k2w = jax.random.split(jax.random.PRNGKey(0), 6)

    # --- Config 1: small shapes consistent with the module (both biases,
    #     n_out > 1).  Exercises the small-S path (tile == S, no padding).
    B, S, n_in, n_out = 2, 8, 32, 2
    x = jax.random.normal(kx, (B, S, n_in), dtype=jnp.float32)
    y = jax.random.normal(ky, (B, S, n_in), dtype=jnp.float32)
    # NOTE: nn.init.zeros_ would make the weight all-zero; use a deterministic
    # random init here so the kernel computes something nontrivial.
    weight = jax.random.normal(
        kw, (n_out, n_in + 1, n_in + 1), dtype=jnp.float32) * 0.1

    out = biaffine_forward(x, y, weight, n_in=n_in, scale=0,
                           bias_x=True, bias_y=True)
    out = jax.block_until_ready(out)
    ref = _reference(x, y, weight, n_in=n_in, scale=0, bias_x=True, bias_y=True)
    assert out.shape == (B, n_out, S, S), out.shape
    err = float(jnp.max(jnp.abs(out - ref)))
    assert err < 5e-2, err

    # --- Config 2: ragged S (200 with 128-tiles -> edge-block clipping, no
    #     output post-slice), resident y (padded to 256), scratch reuse across
    #     k, bias_y=False decomposition, scale != 0, and the n_out==1 squeeze.
    B2, S2, n_in2, n_out2 = 1, 200, 64, 1
    x2 = jax.random.normal(k2x, (B2, S2, n_in2), dtype=jnp.float32)
    y2 = jax.random.normal(k2y, (B2, S2, n_in2), dtype=jnp.float32)
    w2 = jax.random.normal(
        k2w, (n_out2, n_in2 + 1, n_in2), dtype=jnp.float32) * 0.1

    out2 = biaffine_forward(x2, y2, w2, n_in=n_in2, scale=1,
                            bias_x=True, bias_y=False, max_tile=128)
    out2 = jax.block_until_ready(out2)
    ref2 = _reference(x2, y2, w2, n_in=n_in2, scale=1,
                      bias_x=True, bias_y=False)
    assert out2.shape == (B2, S2, S2), out2.shape
    err2 = float(jnp.max(jnp.abs(out2 - ref2)))
    assert err2 < 2e-2, err2

    print("KERNEL_OK")
</pallas_src>

<mosaic_0001>
module attributes {stable_mosaic.version = 11 : i64} {
  func.func @_biaffine_kernel(%arg0: i32, %arg1: i32, %arg2: i32, %arg3: i32, %arg4: memref<1x8x32xbf16, #tpu.memory_space<vmem>>, %arg5: memref<1x8x32xbf16, #tpu.memory_space<vmem>>, %arg6: memref<1x32x33xbf16, #tpu.memory_space<vmem>>, %arg7: memref<1x1x33xbf16, #tpu.memory_space<vmem>>, %arg8: memref<1x1x8x8xf32, #tpu.memory_space<vmem>>, %arg9: memref<8x32xbf16, #tpu.memory_space<vmem>>, %arg10: memref<8x1xf32, #tpu.memory_space<vmem>>) attributes {dimension_semantics = [#tpu.dimension_semantics<parallel>, #tpu.dimension_semantics<parallel>, #tpu.dimension_semantics<parallel>, #tpu.dimension_semantics<arbitrary>], iteration_bounds = array<i64: 2, 2, 1, 1>, scalar_prefetch = 0 : i64, scratch_operands = 2 : i64, tpu.core_type = #tpu.core_type<tc>, window_params = [{transform_indices = @transform_0, window_bounds = array<i64: 1, 8, 32>}, {transform_indices = @transform_1, window_bounds = array<i64: 1, 8, 32>}, {transform_indices = @transform_2, window_bounds = array<i64: 1, 32, 33>}, {transform_indices = @transform_3, window_bounds = array<i64: 1, 1, 33>}, {transform_indices = @transform_4, window_bounds = array<i64: 1, 1, 8, 8>}]} {
    %c0_i32 = arith.constant 0 : i32
    %0 = arith.cmpi eq, %arg3, %c0_i32 : i32
    %1 = arith.extui %0 : i1 to i32
    %c0_i32_0 = arith.constant 0 : i32
    %2 = arith.cmpi ne, %1, %c0_i32_0 : i32
    scf.if %2 {
      %c0_10 = arith.constant 0 : index
      %c0_11 = arith.constant 0 : index
      %c0_12 = arith.constant 0 : index
      %16 = vector.load %arg4[%c0_10, %c0_11, %c0_12] : memref<1x8x32xbf16, #tpu.memory_space<vmem>>, vector<1x8x32xbf16>
      %17 = vector.shape_cast %16 : vector<1x8x32xbf16> to vector<8x32xbf16>
      %c0_13 = arith.constant 0 : index
      %c0_14 = arith.constant 0 : index
      %c0_15 = arith.constant 0 : index
      %18 = vector.load %arg6[%c0_13, %c0_14, %c0_15] : memref<1x32x33xbf16, #tpu.memory_space<vmem>>, vector<1x32x33xbf16>
      %19 = vector.shape_cast %18 : vector<1x32x33xbf16> to vector<32x33xbf16>
      %cst_16 = arith.constant dense<0.000000e+00> : vector<8x33xf32>
      %20 = tpu.matmul %17, %19, %cst_16 {dimension_numbers = #tpu.dot_dimension_numbers<[1], [0], [0], [1], [0, 0, 1, 1], [], []>} : vector<8x32xbf16>, vector<32x33xbf16>, vector<8x33xf32> -> vector<8x33xf32>
      %c0_17 = arith.constant 0 : index
      %c0_18 = arith.constant 0 : index
      %c0_19 = arith.constant 0 : index
      %21 = vector.load %arg7[%c0_17, %c0_18, %c0_19] : memref<1x1x33xbf16, #tpu.memory_space<vmem>>, vector<1x1x33xbf16>
      %22 = vector.shape_cast %21 : vector<1x1x33xbf16> to vector<1x33xbf16>
      %23 = arith.extf %22 : vector<1x33xbf16> to vector<1x33xf32>
      %24 = vector.broadcast %23 : vector<1x33xf32> to vector<8x33xf32>
      %25 = arith.addf %20, %24 : vector<8x33xf32>
      %26 = vector.extract_strided_slice %25 {offsets = [0, 0], sizes = [8, 32], strides = [1, 1]} : vector<8x33xf32> to vector<8x32xf32>
      %27 = arith.truncf %26 : vector<8x32xf32> to vector<8x32xbf16>
      %c0_20 = arith.constant 0 : index
      %c0_21 = arith.constant 0 : index
      %28 = vector.load %arg9[%c0_20, %c0_21] : memref<8x32xbf16, #tpu.memory_space<vmem>>, vector<8x32xbf16>
      tpu.vector_store %arg9[%c0_20, %c0_21], %27 {strides = array<i32>} : memref<8x32xbf16, #tpu.memory_space<vmem>>, vector<8x32xbf16>,
      %29 = vector.extract_strided_slice %25 {offsets = [0, 32], sizes = [8, 1], strides = [1, 1]} : vector<8x33xf32> to vector<8x1xf32>
      %c0_22 = arith.constant 0 : index
      %c0_23 = arith.constant 0 : index
      %30 = vector.load %arg10[%c0_22, %c0_23] : memref<8x1xf32, #tpu.memory_space<vmem>>, vector<8x1xf32>
      tpu.vector_store %arg10[%c0_22, %c0_23], %29 {strides = array<i32>} : memref<8x1xf32, #tpu.memory_space<vmem>>, vector<8x1xf32>,
    } else {
    }
    %c8_i32 = arith.constant 8 : i32
    %3 = arith.muli %arg3, %c8_i32 : i32
    %4 = tpu.assume_multiple %3, 8 : i32
    %c0 = arith.constant 0 : index
    %5 = arith.index_cast %4 : i32 to index
    %c0_1 = arith.constant 0 : index
    %6 = vector.load %arg5[%c0, %5, %c0_1] : memref<1x8x32xbf16, #tpu.memory_space<vmem>>, vector<1x8x32xbf16>
    %7 = vector.shape_cast %6 : vector<1x8x32xbf16> to vector<8x32xbf16>
    %c0_2 = arith.constant 0 : index
    %c0_3 = arith.constant 0 : index
    %8 = vector.load %arg9[%c0_2, %c0_3] : memref<8x32xbf16, #tpu.memory_space<vmem>>, vector<8x32xbf16>
    %cst = arith.constant dense<0.000000e+00> : vector<8x8xf32>
    %9 = tpu.matmul %8, %7, %cst {dimension_numbers = #tpu.dot_dimension_numbers<[1], [1], [0], [0], [0, 0, 1, 0], [], []>} : vector<8x32xbf16>, vector<8x32xbf16>, vector<8x8xf32> -> vector<8x8xf32>
    %c0_4 = arith.constant 0 : index
    %c0_5 = arith.constant 0 : index
    %10 = vector.load %arg10[%c0_4, %c0_5] : memref<8x1xf32, #tpu.memory_space<vmem>>, vector<8x1xf32>
    %11 = vector.broadcast %10 : vector<8x1xf32> to vector<8x8xf32>
    %12 = arith.addf %9, %11 : vector<8x8xf32>
    %c0_6 = arith.constant 0 : index
    %c0_7 = arith.constant 0 : index
    %c0_8 = arith.constant 0 : index
    %c0_9 = arith.constant 0 : index
    %13 = vector.load %arg8[%c0_6, %c0_7, %c0_8, %c0_9] : memref<1x1x8x8xf32, #tpu.memory_space<vmem>>, vector<1x1x8x8xf32>
    %14 = vector.shape_cast %13 : vector<1x1x8x8xf32> to vector<8x8xf32>
    %15 = vector.shape_cast %12 : vector<8x8xf32> to vector<1x1x8x8xf32>
    tpu.vector_store %arg8[%c0_6, %c0_7, %c0_8, %c0_9], %15 {strides = array<i32>} : memref<1x1x8x8xf32, #tpu.memory_space<vmem>>, vector<1x1x8x8xf32>,
    return
  }
  func.func @transform_0(%arg0: i32, %arg1: i32, %arg2: i32, %arg3: i32) -> (i32, i32, i32) {
    %c0_i32 = arith.constant 0 : i32
    %c0_i32_0 = arith.constant 0 : i32
    return %arg0, %arg2, %c0_i32 : i32, i32, i32
  }
  func.func @transform_1(%arg0: i32, %arg1: i32, %arg2: i32, %arg3: i32) -> (i32, i32, i32) {
    %c0_i32 = arith.constant 0 : i32
    %c0_i32_0 = arith.constant 0 : i32
    %c0_i32_1 = arith.constant 0 : i32
    return %arg0, %c0_i32, %c0_i32_0 : i32, i32, i32
  }
  func.func @transform_2(%arg0: i32, %arg1: i32, %arg2: i32, %arg3: i32) -> (i32, i32, i32) {
    %c0_i32 = arith.constant 0 : i32
    %c0_i32_0 = arith.constant 0 : i32
    %c0_i32_1 = arith.constant 0 : i32
    return %arg1, %c0_i32, %c0_i32_0 : i32, i32, i32
  }
  func.func @transform_3(%arg0: i32, %arg1: i32, %arg2: i32, %arg3: i32) -> (i32, i32, i32) {
    %c0_i32 = arith.constant 0 : i32
    %c0_i32_0 = arith.constant 0 : i32
    %c0_i32_1 = arith.constant 0 : i32
    return %arg1, %c0_i32, %c0_i32_0 : i32, i32, i32
  }
  func.func @transform_4(%arg0: i32, %arg1: i32, %arg2: i32, %arg3: i32) -> (i32, i32, i32, i32) {
    %c0_i32 = arith.constant 0 : i32
    return %arg0, %arg1, %arg2, %arg3 : i32, i32, i32, i32
  }
}

</mosaic_0001>

<bundles_post_ra>
// kernel: tpu_custom_call.1
= control target key start
LH: loop header
LB: loop body
LE: loop exit
PB: predicated region body
PF: predicated region fallthrough
CT: control target
= control target key end

     0   :  { %s1411_s0 = inlined_call_operand.hbm [shape: bf16[2,8,32], index: 0, kind: input, shape index: {}]   ;;  %s1412_s1 = inlined_call_operand.hbm [shape: bf16[2,8,32], index: 1, kind: input, shape index: {}]   ;;  %s1413_s2 = inlined_call_operand.hbm [shape: bf16[2,32,33], index: 2, kind: input, shape index: {}]   ;;  %s1414_s3 = inlined_call_operand.vmem [shape: bf16[2,1,33], index: 3, kind: input, shape index: {}]   ;;  %s1415_s4 = inlined_call_operand.hbm [shape: f32[2,2,8,8], index: 4, kind: output, shape index: {}]  }
   0x1   :  { %1429 = sst [smem:[#allocation28_spill]] %s1412_s1 }
   0x2   :  { %1430 = sst [smem:[#allocation29_spill]] %s1415_s4 }
   0x3   :  { %9 = vsyncpa [#allocation5], 0 }
   0x4   :  { %11 = vsyncpa [#allocation5 + $0x1], 0 }
   0x5   :  { %12 = vsyncpa [#allocation8], 0 }
   0x6   :  { %14 = vsyncpa [#allocation8 + $0x1], 0 }
   0x7   :  { %15 = vsyncpa [#allocation6], 0 }
   0x8   :  { %17 = vsyncpa [#allocation6 + $0x1], 0  ;;  %s1106_s15 = smov 0   ;;  %s1108_s16 = smov 0  }
   0x9   :  { %s1110_s17 = smov 0   ;;  %s1112_s18 = smov 0  }
   0xa   :  { %s1114_s19 = smov 0   ;;  %s1116_s20 = smov 0  }
   0xb   :  { %s1118_s21 = smov 0   ;;  %s1120_s22 = smov 0  }
   0xc   :  { %s1122_s23 = smov 0   ;;  %s1124_s24 = smov 0  }
   0xd   :  { %s1126_s25 = smov 0   ;;  %s1128_s26 = smov 0  }
   0xe   :  { %s1130_s27 = smov 0   ;;  %s1132_s28 = smov 0  }
   0xf LB: > { %1431 = sst [smem:[#allocation15_spill]] %s1017_s15  ;;  %s1175_s29 = sadd.s32 4294967295, %s1069_s28   ;;  %s1069_s28 = sphi %s1132_s28, %s23_s28   ;;  %s1065_s27 = sphi %s1130_s27, %s1472_s27   ;;  %s1061_s26 = sphi %s1128_s26, %s1482_s26   ;;  %s1057_s25 = sphi %s1126_s25, %s1470_s25   ;;  %s1053_s24 = sphi %s1124_s24, %s1481_s24   ;;  %s1049_s23 = sphi %s1122_s23, %s1480_s23   ;;  %s1045_s22 = sphi %s1120_s22, %s1479_s22   ;;  %s1041_s21 = sphi %s1118_s21, %s1478_s21   ;;  %s1037_s20 = sphi %s1116_s20, %s1477_s20   ;;  %s1033_s19 = sphi %s1114_s19, %s1476_s19   ;;  %s1029_s18 = sphi %s1112_s18, %s1475_s18   ;;  %s1025_s17 = sphi %s1110_s17, %s1467_s17   ;;  %s1021_s16 = sphi %s1108_s16, %s1466_s16   ;;  %s1017_s15 = sphi %s1106_s15, %s1474_s15  }
  0x10   : > { %1432 = sst [smem:[#allocation16_spill]] %s1021_s16  ;;  %s45_s5 = sadd.s32 1, %s1061_s26 }
  0x11   : > { %1433 = sst [smem:[#allocation17_spill]] %s1025_s17  ;;  %s49_s6 = sadd.s32 1, %s1065_s27 }
  0x12   : > { %1434 = sst [smem:[#allocation18_spill]] %s1057_s25  ;;  %p47_p0 = scmp.ge.s32.totalorder %s45_s5, 2 }
  0x13   : > { %1435 = sst [smem:[#allocation19_spill]] %s1065_s27  ;;  %s58_s7 = sadd.s32 1, %s1049_s23 }
  0x14   : > { %1436 = sst [smem:[#allocation20_spill]] %s1069_s28  ;;  %p65_p1 = scmp.ne.s32.totalorder %s1049_s23, %s1045_s22 }
  0x15   : > { %p66_p2 = scmp.eq.s32.totalorder %s1069_s28, 0  ;;  %s1484_s5 = smov (%p47_p0, %s45_s5), 0 }
  0x16   : > { %1437 = sst [smem:[#allocation21_spill]] %s1484_s5  ;;  %s1486_s6 = smov (!%p47_p0, %s49_s6), %s1065_s27 }
  0x17   : > { %p1189_p3 = por %p66_p2, %p65_p1  ;;  %p71_p4 = scmp.ne.s32.totalorder %s1045_s22, %s1041_s21 }
  0x18   : > { %p51_p5 = scmp.ge.s32.totalorder %s1486_s6, 2  ;;  %p72_p6 = scmp.eq.s32.totalorder %s1175_s29, 0 }
  0x19   : > { %s107_s9 = ssub.s32 %s1061_s26, %s1484_s5  ;;  %s110_s10 = sadd.s32 1, %s1037_s20 }
  0x1a   : > { %s1488_s6 = smov (%p51_p5, %s1486_s6), 0  ;;  %p1202_p7 = por %p72_p6, %p71_p4 }
  0x1b   : > { %1439 = sst [smem:[#allocation22_spill]] %s1488_s6  ;;  %p108_p8 = scmp.eq.s32.totalorder %s107_s9, 0 }
  0x1c   : > { %s53_s12 = ssub.s32 %s1065_s27, %s1488_s6  ;;  %p117_p9 = scmp.ne.s32.totalorder %s1037_s20, %s1033_s19 }
  0x1d   : > { %p56_p10 = scmp.eq.s32.totalorder %s53_s12, 0  ;;  %p123_p11 = scmp.ne.s32.totalorder %s1033_s19, %s1029_s18 }
  0x1e   : > { %s1213_s13 = scalar_select %p108_p8, %s1037_s20, %s110_s10  }
  0x1f   : > { %s1216_s14 = scalar_select %p56_p10, %s1049_s23, %s58_s7  }
  0x20   : > { %1441 = sst [smem:[#allocation23_spill]] %s1213_s13  ;;  %p1220_p12 = por %p117_p9, %p66_p2 }
  0x21   : > { %1442 = sst [smem:[#allocation24_spill]] %s1216_s14  ;;  %p1226_p13 = por %p123_p11, %p72_p6 }
  0x22   : > { %s161_s18 = sor.u32 %s107_s9, %s53_s12  ;;  %s168_s6 = sadd.s32 1, %s1025_s17 }
  0x23   : > { %p166_p0 = scmp.eq.s32.totalorder %s161_s18, 0  ;;  %p178_p1 = scmp.ne.s32.totalorder %s1025_s17, %s1021_s16 }
  0x24   : > { %p179_p4 = scmp.eq.s32.totalorder %s1175_s29, 3  ;;  %p184_p5 = scmp.ne.s32.totalorder %s1021_s16, %s1017_s15 }
  0x25   : > { %s1237_s7 = scalar_select %p166_p0, %s1025_s17, %s168_s6  }
  0x26   : > { %p1239_p2 = por %p179_p4, %p178_p1  ;;  %s1448_s5 = sadd.s32 4294967294, %s1069_s28  }
  0x27   : > { %1445 = sst [smem:[#allocation25_spill]] %s1237_s7  ;;  %p185_p6 = scmp.eq.s32.totalorder %s1448_s5, 3 }
  0x28   : > { %s1446_s10 = scalar_select %p1239_p2, 1, 0 }
  0x29   : > { %p710_p8 = scmp.lt.s32.totalorder %s1069_s28, 4  ;;  %p1246_p9 = por %p185_p6, %p184_p5 }
  0x2a   : > { %1447 = sst [smem:[#allocation26_spill]] %s1446_s10  ;;  %s1421_s9 = sand.u32 1, %s1049_s23  }
  0x2b   : > { %s1449_s14 = scalar_select %p1246_p9, 1, 0 }
  0x2c   : > { %s1253_s12 = sshll.u32 %s1421_s9, 2  ;;  %s648_s18 = sshll.u32 %s1065_s27, 6 }
  0x2d   : > { %1450 = sst [smem:[#allocation27_spill]] %s1449_s14  ;;  %p1258_p10 = pnand %p710_p8, %p1189_p3 }
  0x2e   : > { %s224_s13 = sand.u32 1, %s1069_s28   ;;  %s1452_s1 = sld [smem:[#allocation28_spill]] }
  0x2f   : > { %s228_s15 = scalar_lea.vmem [#allocation7], %s1253_s12  ;;  %p1269_p11 = pnand %p710_p8, %p1220_p12 }
  0x30   : > { %s235_s14 = sshll.u32 %s228_s15, 4  ;;  %p654_p0 = scmp.ge.s32.totalorder %s1069_s28, 1  ;;  %s236_s14 = int_to_ptr.vmem [resolvable:$true] %s235_s14 }
  0x31   : > { %s1274_s8 = scalar_lea.sflag [#allocation8], %s224_s13  ;;  %p835_p3 = pneg %p1258_p10 }
  0x32   : > { %s846_s27 = scalar_lea.vmem %s236_s14, 64  ;;  %s1071_s7 = smov [#allocation7]  }
  0x33   : > { %p847_p1 = scmp.ne.s32.totalorder %s236_s14, %s846_s27  ;;  %s851_s5 = sshll.u32 %s1071_s7, 4  ;;  %s852_s5 = int_to_ptr.vmem [resolvable:$false] %s851_s5 }
  0x34   : > { %s233_s17 = scalar_lea.hbm %s1452_s1, %s648_s18  ;;  %s853_s15 = scalar_lea.vmem %s852_s5, 128 }
  0x35   : > { %p849_p4 = pnand %p847_p1, %p835_p3  ;;  %p854_p12 = scmp.lt.s32.totalorder %s236_s14, %s852_s5 }
  0x36   : > { %p855_p6 = scmp.lt.s32.totalorder %s853_s15, %s846_s27 }
  0x37   : > { %p850_p5 = pneg %p849_p4 }
  0x38   : > { %p856_p8 = por %p855_p6, %p854_p12 }
  0x3a   : > { %p857_p9 = pnand %p856_p8, %p850_p5 }
  0x3c   : > { %860 = shalt.err (!%p857_p9)
}
  0x3d   : > { %702 = dma.hbm_to_vmem [thread:$0]  (!%p1258_p10), %s233_s17, 64, %s236_s14, %s1274_s8  }
  0x3e   : > { %p267_p1 = scmp.lt.s32.totalorder %s1069_s28, 5  ;;  %s215_s7 = scalar_lea.hbm %s1411_s0, %s648_s18 }
  0x3f   : > { %s209_s5 = scalar_lea.vmem [#allocation4], %s1253_s12  ;;  %s244_s1 = sand.u32 1, %s1037_s20  }
  0x40   : > { %p1287_p4 = pnand %p654_p0, %p267_p1  ;;  %s217_s15 = sshll.u32 %s209_s5, 4  ;;  %s218_s15 = int_to_ptr.vmem [resolvable:$true] %s217_s15 }
  0x41   : > { %s651_s4 = sshll.u32 %s244_s1, 4  ;;  %s1455_s10 = sand.u32 1, %s1049_s23  }
  0x42   : > { %s206_s25 = scalar_lea.sflag [#allocation5], %s1455_s10  ;;  %s874_s16 = scalar_lea.vmem %s218_s15, 64 }
  0x43   : > { %p875_p9 = scmp.ne.s32.totalorder %s218_s15, %s874_s16  ;;  %s1072_s17 = smov [#allocation4]  }
  0x44   : > { %s879_s14 = sshll.u32 %s1072_s17, 4  ;;  %s880_s14 = int_to_ptr.vmem [resolvable:$false] %s879_s14 }
  0x45   : > { %p877_p5 = pnand %p875_p9, %p835_p3  ;;  %s881_s28 = scalar_lea.vmem %s880_s14, 128 }
  0x46   : > { %p882_p12 = scmp.lt.s32.totalorder %s218_s15, %s880_s14  ;;  %p883_p6 = scmp.lt.s32.totalorder %s881_s28, %s874_s16 }
  0x47   : > { %p878_p0 = pneg %p877_p5 }
  0x48   : > { %p884_p8 = por %p883_p6, %p882_p12 }
  0x4a   : > { %p885_p1 = pnand %p884_p8, %p878_p0 }
  0x4c   : > { %888 = shalt.err (!%p885_p1)
}
  0x4d   : > { %699 = dma.hbm_to_vmem [thread:$0]  (!%p1258_p10), %s215_s7, 64, %s218_s15, %s206_s25  }
  0x4e   : > { %s668_s1 = sshll.u32 %s1061_s26, 8  ;;  %s246_s27 = scalar_lea.vmem [#allocation9], %s651_s4 }
  0x4f   : > { %s252_s18 = scalar_lea.hbm %s1413_s2, %s668_s1  ;;  %s253_s21 = sshll.u32 %s246_s27, 4  ;;  %s254_s21 = int_to_ptr.vmem [resolvable:$true] %s253_s21 }
  0x50   : > { %p891_p3 = pneg %p1269_p11  ;;  %s902_s5 = scalar_lea.vmem %s254_s21, 256 }
  0x51   : > { %p903_p9 = scmp.ne.s32.totalorder %s254_s21, %s902_s5  ;;  %s1073_s16 = smov [#allocation9]  }
  0x52   : > { %s907_s28 = sshll.u32 %s1073_s16, 4  ;;  %s908_s28 = int_to_ptr.vmem [resolvable:$false] %s907_s28 }
  0x53   : > { %p905_p5 = pnand %p903_p9, %p891_p3  ;;  %s909_s6 = scalar_lea.vmem %s908_s28, 512 }
  0x54   : > { %p910_p12 = scmp.lt.s32.totalorder %s254_s21, %s908_s28  ;;  %p911_p10 = scmp.lt.s32.totalorder %s909_s6, %s902_s5 }
  0x55   : > { %p906_p0 = pneg %p905_p5 }
  0x56   : > { %p912_p6 = por %p911_p10, %p910_p12 }
  0x58   : > { %p913_p8 = pnand %p912_p6, %p906_p0 }
  0x5a   : > { %916 = shalt.err (!%p913_p8)
}
  0x5b   : > { %s1074_s25 = smov 64   ;;  %s1075_s4 = smov 4  }
  0x5c   : > { %705 = dma.hbm_to_vmem [thread:$0]  (!%p1269_p11), %s252_s18, 256, %s254_s21, %s1274_s8, %s1074_s25, %s1074_s25, %s1075_s4  }
  0x5d   : > { %271 = sbr.rel (%p1287_p4) target bundleno = 573 (0x23d), region = 36  ;;  %s273_s7 = sand.u32 (!%p1287_p4), 1, %s1045_s22  }
  0x5e   : > { %s1315_s15 = sshll.u32 (!%p1287_p4), %s273_s7, 2  ;;  %s274_s17 = scalar_lea.sflag (!%p1287_p4), [#allocation5], %s273_s7 }
  0x5f   : > { %s277_s14 = scalar_lea.vmem (!%p1287_p4), [#allocation4], %s1315_s15 }
  0x62   : > { %1000 = dma.done.wait (%p1202_p7), %s274_s17, 64  }
  0x63   : > { %1002 = vsyncadd (%p1202_p7), %s274_s17, 4294967232  ;;  %s282_s9 = sand.u32 1, %s1175_s29   ;;  %s286_s13 = scalar_lea.vmem [#allocation7], %s1315_s15 }
  0x64   : > { %s283_s8 = scalar_lea.sflag [#allocation8], %s282_s9 }
  0x65   : > { %1004 = dma.done.wait (%p1202_p7), %s283_s8, 64  }
  0x66   : > { %1006 = vsyncadd (%p1202_p7), %s283_s8, 4294967232  ;;  %s293_s1 = sand.u32 1, %s1033_s19  }
  0x67   : > { %s657_s10 = sshll.u32 %s293_s1, 4 }
  0x68   : > { %s295_s12 = scalar_lea.vmem [#allocation9], %s657_s10 }
  0x69   : > { %1008 = dma.done.wait (%p1226_p13), %s283_s8, 256  }
  0x6a   : > { %1010 = vsyncadd (%p1226_p13), %s283_s8, 4294967040  ;;  %v1076_v0 = vmov 0.0   ;;  %vm1077_vm0 = vmmov 0   ;;  %v831_v1 = vld [vmem:[%s295_s12 + $0x8] sm:$0xff]   ;;  %v832_v2 = vld [vmem:[%s295_s12] sm:$0xff]   ;;  %vm364_vm1 = vcmask 261120   ;;  %v348_v6 = vlaneseq }
  0x6b   : > { %674 = vmatprep.subr.bf16.mxu0 %v1076_v0  ;;  %678 = vmatprep.mubr.msk.bf16.mxu0 %vm1077_vm0, %v1076_v0  ;;  %v341_v3 = vld [vmem:[%s277_s14] sm:$0xf]  ;;  %v422_v4 = vld [vmem:[%s286_s13] sm:$0xf]  ;;  %p333_p7 = scmp.lt.s32.totalorder %s1053_s24, 1  ;;  %v1078_v9 = vmov 0  }
  0x6c   : > { %682 = vmatprep.subr.bf16.mxu1 %v1076_v0  ;;  %684 = vmatprep.mubr.msk.bf16.mxu1 %vm1077_vm0, %v1076_v0  ;;  %v435_v5 = vsel %vm364_vm1, %v422_v4, 0  ;;  %v349_v7 = vshrl.u32 %v348_v6, 7  ;;  %vm409_vm2 = vcmask 257024   ;;  %s1079_s27 = smov 96   ;;  %s1456_s21 = sld [smem:[#allocation16_spill]]  ;;  %vm415_vm3 = vcmask 7168  }
  0x6d   : > { %675 = vmatpush3.bf16.msra.mxu0 %v831_v1  ;;  %683 = vmatpush3.bf16.xpose.msra.mxu1 %v435_v5  ;;  %s334_s29 = scalar_select %p333_p7, %s1053_s24, 1  ;;  %vm477_vm4 = vcmask 64512  }
  0x6e   : > { %676 = vmatprep.subr.bf16.mxu0 %v1076_v0  ;;  %830 = vset.pattern.permute.xlu0 %v1078_v9  ;;  %v350_v11 = vsub.s32 0, %v349_v7  ;;  %s1457_s5 = sld [smem:[#allocation18_spill]]  ;;  %s1080_s12 = smov [#allocation10]  }
  0x6f   : > { %s335_s18 = scalar_lea.vmem %s1414_s3, %s334_s29  ;;  %s1459_s8 = sld [smem:[#allocation29_spill]] }
  0x70   : > { %v346_v8 = vld [vmem:[%s335_s18] sm:$0x1] }
  0x71   : > { %677 = vmatpush3.bf16.msra.mxu0 %v832_v2  ;;  %v347_v10 = vunpack.c.l.bf16 %v346_v8 }
  0x72   : > { %s330_s16 = sand.u32 1, %s1456_s21  }
  0x73   : > { %v351_v12 = vrot.slane %v347_v10, %v350_v11  ;;  %s658_s6 = sshll.u32 %s330_s16, 3  ;;  %s480_s1 = scalar_lea.sflag [#allocation6], %s330_s16 }
  0x74   : > { %679 = vmatmul.mubr.msk.bf16.vlgmr.msra.gmra.mxu0 %vm364_vm1, %v341_v3  ;;  %s664_s25 = sshll.u32 %s1457_s5, 1  ;;  %s332_s15 = scalar_lea.vmem [#allocation10], %s658_s6 }
  0x75   : > { %s493_s4 = sadd.s32 %s1053_s24, %s664_s25  ;;  %s497_s17 = sshll.u32 %s332_s15, 4  ;;  %s498_s17 = int_to_ptr.vmem [resolvable:$true] %s497_s17 }
  0x76   : > { %s665_s7 = sshll.u32 %s493_s4, 7  ;;  %s917_s10 = scalar_lea.vmem %s498_s17, 128 }
  0x77   : > { %s495_s13 = scalar_lea.hbm %s1459_s8, %s665_s7  ;;  %p918_p13 = scmp.ne.s32.totalorder %s498_s17, %s917_s10 }
  0x78   : > { %s921_s24 = sshll.u32 %s1080_s12, 4  ;;  %s922_s24 = int_to_ptr.vmem [resolvable:$false] %s921_s24 }
  0x79   : > { %p919_p11 = pnand %p918_p13, %p1239_p2  ;;  %s923_s29 = scalar_lea.vmem %s922_s24, 256 }
  0x7a   : > { %p924_p1 = scmp.lt.s32.totalorder %s498_s17, %s922_s24  ;;  %p925_p3 = scmp.lt.s32.totalorder %s923_s29, %s917_s10 }
  0x7b   : > { %p920_p4 = pneg %p919_p11 }
  0x7c   : > { %p926_p9 = por %p925_p3, %p924_p1 }
  0x7e   : > { %p927_p5 = pnand %p926_p9, %p920_p4 }
 0x134   : > { %v402_v13 = vpop.f32.mrf.mxu0 }
 0x135   : > { %v403_v14 = vadd.f32 %v402_v13, %v351_v12 }
 0x136   : > { %v680_v15 = vpop.f32.mrf.mxu0 }
 0x137   : > { %v408_v16 = vpack.c.bf16 %v403_v14, %v403_v14  ;;  %412 = vrot.lane.b32.xlu0 %v403_v14, %s1079_s27 }
 0x138   : > { %v405_v17 = vpop.f32.mrf.mxu0 }
 0x139   : > { %410 = vst.msk [vmem:[#allocation2] sm:$0xf] %vm409_vm2, %v408_v16 }
 0x13a   : > { %v681_v18 = vpop.f32.mrf.mxu0 }
 0x140   : > { %v423_v19 = vld [vmem:[#allocation2] sm:$0xf] }
 0x141   : > { %685 = vmatmul.mubr.msk.bf16.vlgmr.msra.gmra.mxu1 %vm364_vm1, %v423_v19 }
 0x1a9   : > { %v413_v20 = vpop.permute.xlu0 %412 }
 0x1aa   : > { %416 = vst.msk [vmem:[#allocation3] sm:$0xff] %vm415_vm3, %v413_v20 }
 0x1b1   : > { %v424_v21 = vld [vmem:[#allocation3] sm:$0xff] }
 0x1b2   : > { %427 = vperm.xlu0 %830, %v424_v21  }
 0x201   : > { %v471_v22 = vpop.f32.mrf.mxu1 }
 0x203   : > { %v686_v23 = vpop.f32.mrf.mxu1 }
 0x205   : > { %v474_v24 = vpop.f32.mrf.mxu1 }
 0x207   : > { %v687_v25 = vpop.f32.mrf.mxu1 }
 0x22d   : > { %v428_v26 = vpop.permute.xlu0 %427 }
 0x22e   : > { %v472_v27 = vadd.f32 %v471_v22, %v428_v26 }
 0x230   : > { %478 = vst.msk [vmem:[%s332_s15] sm:$0xff] %vm477_vm4, %v472_v27 }
 0x231   : > { %930 = shalt.err (!%p927_p5)
}
 0x232   : > { %s931_s30 = scalar_lea.hbm %s495_s13, 128  ;;  %s935_s27 = scalar_lea.hbm %s1459_s8, 512 }
 0x233   : > { %p932_p0 = scmp.ne.s32.totalorder %s495_s13, %s931_s30  ;;  %p936_p6 = scmp.lt.s32.totalorder %s495_s13, %s1459_s8 }
 0x234   : > { %p937_p8 = scmp.lt.s32.totalorder %s935_s27, %s931_s30 }
 0x235   : > { %p933_p12 = pnand %p932_p0, %p1239_p2 }
 0x236   : > { %p938_p7 = por %p937_p8, %p936_p6 }
 0x237   : > { %p934_p10 = pneg %p933_p12 }
 0x239   : > { %p939_p13 = pnand %p938_p7, %p934_p10 }
 0x23b   : > { %942 = shalt.err (!%p939_p13)
}
 0x23c   : > { %694 = dma.vmem_to_hbm [thread:$0]  (%p1239_p2), %s498_s17, 128, %s495_s13, %s480_s1  }
 0x23d PF: > { %s1460_s16 = sld [smem:[#allocation20_spill]] }
 0x23e   : > { %s1461_s6 = sld [smem:[#allocation15_spill]] }
 0x23f   : > { %s1462_s25 = sld [smem:[#allocation27_spill]] }
 0x243   : > { %p711_p11 = scmp.ge.s32.totalorder %s1460_s16, 2 }
 0x244   : > { %s509_s4 = sand.u32 1, %s1461_s6  }
 0x245   : > { %p1463_p4 = scmp.ne.s32.totalorder %s1462_s25, 0  ;;  %s510_s7 = scalar_lea.sflag [#allocation6], %s509_s4 }
 0x247   : > { %p707_p1 = pnand %p711_p11, %p1463_p4 }
 0x249   : > { %p708_p3 = pneg %p707_p1 }
 0x24b   : > { %1012 = dma.done.wait (%p708_p3), %s510_s7, 128  }
 0x24c   : > { %1014 = vsyncadd (%p708_p3), %s510_s7, 4294967168  ;;  %s23_s28 = sadd.s32 1, %s1460_s16   ;;  %s1465_s14 = sld [smem:[#allocation16_spill]] }
 0x24d   : > { %p1364_p9 = scmp.ge.s32.totalorder %s23_s28, 6   ;;  %s1466_s16 = sld [smem:[#allocation17_spill]] }
 0x24e   : > { %s1467_s17 = sld [smem:[#allocation25_spill]]  ;;  %s1475_s18 = smov %s1033_s19 }
 0x24f   : > { %s1468_s9 = sld [smem:[#allocation23_spill]]  ;;  %s1476_s19 = smov %s1037_s20 }
 0x250   : > { %s1469_s13 = sld [smem:[#allocation24_spill]]  ;;  %s1478_s21 = smov %s1045_s22 }
 0x251   : > { %s1470_s25 = sld [smem:[#allocation19_spill]]  ;;  %s1479_s22 = smov %s1049_s23 }
 0x252   : > { %s1471_s1 = sld [smem:[#allocation21_spill]]  ;;  %s1474_s15 = smov %s1465_s14 }
 0x253   : > { %s1472_s27 = sld [smem:[#allocation22_spill]]  ;;  %s1481_s24 = smov %s1061_s26 }
 0x254   :  { %22 = sbr.rel (!%p1364_p9) target bundleno = 15 (0xf), region = 113 }
 0x255   : > { %s1477_s20 = smov %s1468_s9 }
 0x256   : > { %s1480_s23 = smov %s1469_s13 }
 0x258   : > { %s1482_s26 = smov %s1471_s1 }
 0x259   :  { %515 = vsyncpa [#allocation5], 1 }
 0x25a   :  { %517 = vsyncpa [#allocation5 + $0x1], 1 }
 0x25b   :  { %518 = vsyncpa [#allocation8], 1 }
 0x25c   :  { %520 = vsyncpa [#allocation8 + $0x1], 1 }
 0x25d   :  { %521 = vsyncpa [#allocation6], 1 }
 0x25e   :  { %523 = vsyncpa [#allocation6 + $0x1], 1 }

</bundles_post_ra>
